<compile_context>
chip_gen: v6e
topology: v6e:2x2x1
jax: 0.10.0
libtpu: 0.0.40
codegen_flags: <defaults>
</compile_context>

<pallas_src>
import functools

import jax
import jax.numpy as jnp
from jax import lax
from jax.experimental import pallas as pl
from jax.experimental.pallas import tpu as pltpu

_MIB = 1 << 20


def _round_up(x, m):
    return ((x + m - 1) // m) * m


def _device_plan():
    """(vmem_budget_bytes, default_num_splits) for the local TPU generation."""
    try:
        kind = jax.devices()[0].device_kind.lower()
    except Exception:  # pragma: no cover - defensive
        kind = ""
    if "v7" in kind or "7x" in kind:
        return 52 * _MIB, 2      # 64 MiB physical per TensorCore; 2 TCs -> parallel split
    if "v6" in kind:
        return 104 * _MIB, 1     # 128 MiB physical, 1 TC
    if "v5" in kind or "v4" in kind:
        return 96 * _MIB, 1      # 128 MiB physical, 1 TC
    return 28 * _MIB, 1          # unknown part: stay near default scoped limits


def _logreg2_bce_kernel(w_ref, bias_ref, x_ref, y_ref, out_ref, acc_ref, *,
                        n_rows, tile_rows, blocks_per_split, inv_n):
    c = pl.program_id(0)          # row-range split (parallel; both TCs on v7x)
    i = pl.program_id(1)          # reduction over row tiles (arbitrary)

    @pl.when(i == 0)
    def _init():
        acc_ref[...] = jnp.zeros_like(acc_ref)

    x = x_ref[...]                # (tile_rows, F)  stream dtype (bf16 by default)
    y = y_ref[...]                # (1, tile_rows)  f32
    w = w_ref[...]                # (8, F) stream dtype -- row 0 = weights, rows 1..7 = 0
    bias = bias_ref[0]            # scalar bias (SMEM, f32)

    # Lane-dense logits: (8, tile_rows); only sublane-row 0 is meaningful.
    # bf16 x bf16 -> single MXU pass, f32 accumulation.
    f = lax.dot_general(w, x, (((1,), (1,)), ((), ())),
                        preferred_element_type=jnp.float32) + bias

    # Numerically stable BCE-with-logits (same formulation PyTorch uses):
    #   loss_i = max(f, 0) - f * y + log1p(exp(-|f|))
    per = jnp.maximum(f, 0.0) - f * y + jnp.log1p(jnp.exp(-jnp.abs(f)))

    n_groups = tile_rows // 128

    def _accumulate(vals):
        # Fold the (8, tile_rows) slab into one (8, 128) vreg with lane-tile-aligned
        # adds, then accumulate into the tiny scratch (no (8, tn) load/store traffic).
        s = vals[:, 0:128]
        for g in range(1, n_groups):
            s = s + vals[:, g * 128:(g + 1) * 128]
        acc_ref[...] += s

    base = (c * blocks_per_split + i) * tile_rows
    is_tail = base + tile_rows > n_rows   # overhanging boundary tile or phantom block

    @pl.when(jnp.logical_not(is_tail))
    def _full_tile():
        _accumulate(per)                  # no masks on the hot path

    @pl.when(is_tail)
    def _tail_tile():
        # Select-based masking of the ragged tail / phantom blocks (select never
        # propagates NaN/Inf from the stale padded region of the block).
        col = base + lax.broadcasted_iota(jnp.int32, per.shape, 1)
        _accumulate(jnp.where(col < n_rows, per, 0.0))

    @pl.when(i == blocks_per_split - 1)
    def _finalize():
        # Only sublane-row 0 of the accumulator carries real data.
        part = jnp.sum(acc_ref[0:1, :]) * inv_n
        out_ref[...] = jnp.zeros(out_ref.shape, out_ref.dtype) + part


def logreg2_forward(x, y, beta, *, stream_dtype=jnp.bfloat16, tile_rows=None,
                    num_splits=None):
    """Reproduces LogReg2.forward(x, y): scalar mean BCE-with-logits loss."""
    x = jnp.asarray(x)
    n, nfeat = x.shape
    y = jnp.asarray(y, jnp.float32).reshape(1, n)
    beta = jnp.asarray(beta, jnp.float32).reshape(nfeat + 1)

    stream_dtype = jnp.dtype(stream_dtype)
    x = x.astype(stream_dtype)
    # Weights padded to 8 sublanes (row 0 real, rows 1..7 zero); bias as an SMEM scalar.
    w8 = jnp.zeros((8, nfeat), jnp.float32).at[0].set(beta[:nfeat]).astype(stream_dtype)
    bias = beta[nfeat:]                                    # shape (1,), f32

    # --- tile-size / VMEM planning ------------------------------------------------
    vmem_cap, default_splits = _device_plan()
    if num_splits is None:
        num_splits = default_splits

    itemsize = stream_dtype.itemsize
    fp = _round_up(max(nfeat, 1), 128)                     # lane padding of (tn, F) block
    # Per-row VMEM footprint: double-buffered x + double-buffered y (sublane-padded)
    # + rough allowance for the f32 logits/loss temporaries.
    per_row = 2 * fp * itemsize + 2 * 8 * 4 + 96
    fixed = 2 * 8 * fp * itemsize + 1 * _MIB               # resident weights + misc
    avail = max(vmem_cap - fixed, 0)
    budget_rows = max(128, (avail // per_row) // 128 * 128)

    if tile_rows is None:
        tn = min(budget_rows, 32768, _round_up(n, 128))
    else:
        tn = min(_round_up(int(tile_rows), 128), _round_up(n, 128))
    tn = max(128, (tn // 128) * 128)

    n_blocks = pl.cdiv(n, tn)
    num_splits = max(1, min(int(num_splits), n_blocks))
    bps = pl.cdiv(n_blocks, num_splits)        # blocks per split
    last_block = n_blocks - 1                  # clamp phantom blocks in-bounds

    def x_map(c, i):
        return (jnp.minimum(c * bps + i, last_block), 0)

    def y_map(c, i):
        return (0, jnp.minimum(c * bps + i, last_block))

    kernel = functools.partial(
        _logreg2_bce_kernel,
        n_rows=n, tile_rows=tn, blocks_per_split=bps, inv_n=1.0 / n)

    partials = pl.pallas_call(
        kernel,
        out_shape=jax.ShapeDtypeStruct((1, num_splits * 128), jnp.float32),
        grid=(num_splits, bps),
        in_specs=[
            pl.BlockSpec((8, nfeat), lambda c, i: (0, 0)),        # w8 (resident)
            pl.BlockSpec(memory_space=pltpu.MemorySpace.SMEM),    # bias scalar
            pl.BlockSpec((tn, nfeat), x_map),                     # x row tiles
            pl.BlockSpec((1, tn), y_map),                         # y lane-dense tiles
        ],
        out_specs=pl.BlockSpec((1, 128), lambda c, i: (0, c)),    # per-split partial
        scratch_shapes=[pltpu.VMEM((8, 128), jnp.float32)],       # tiny running sum
        compiler_params=pltpu.CompilerParams(
            dimension_semantics=("parallel", "arbitrary"),
            vmem_limit_bytes=int(vmem_cap)),
    )(w8, bias, x, y)

    # One partial (already scaled by 1/N) per split, splat across 128 lanes -> take
    # lane 0 of each split's block and add them.
    return jnp.sum(partials.reshape(num_splits, 128)[:, 0])


def _reference_forward(x, y, beta):
    """Pure-JAX reference (matches torch BCEWithLogitsLoss on [x | 1] @ beta)."""
    n = x.shape[0]
    xa = jnp.concatenate(
        [x.astype(jnp.float32), jnp.ones((n, 1), jnp.float32)], axis=1)
    f = xa @ beta.astype(jnp.float32)
    yf = y.astype(jnp.float32)
    per = jnp.maximum(f, 0.0) - f * yf + jnp.log1p(jnp.exp(-jnp.abs(f)))
    return jnp.mean(per)


if __name__ == "__main__":
    key = jax.random.PRNGKey(0)
    kx, ky, kb, kx2, ky2 = jax.random.split(key, 5)

    # Small shapes consistent with the module.
    N, NFEAT = 8, 32
    x = jax.random.normal(kx, (N, NFEAT), dtype=jnp.float32)
    y = (jax.random.uniform(ky, (N,)) > 0.5).astype(jnp.float32)
    # Module __init__ uses zeros([nfeat + 1]); use a small nonzero beta so the
    # matmul + bias path is actually exercised.
    beta = 0.1 * jax.random.normal(kb, (NFEAT + 1,), dtype=jnp.float32)

    # 1) f32 streaming path: bit-close to the PyTorch module.
    loss = jax.block_until_ready(
        logreg2_forward(x, y, beta, stream_dtype=jnp.float32))
    ref = _reference_forward(x, y, beta)
    assert jnp.allclose(loss, ref, rtol=1e-5, atol=1e-5), (loss, ref)

    # 2) Multi-tile / multi-split / ragged-tail / phantom-block path (f32, forced tiles).
    N2 = 300
    x2 = jax.random.normal(kx2, (N2, NFEAT), dtype=jnp.float32)
    y2 = (jax.random.uniform(ky2, (N2,)) > 0.5).astype(jnp.float32)
    loss2 = jax.block_until_ready(
        logreg2_forward(x2, y2, beta, stream_dtype=jnp.float32,
                        tile_rows=128, num_splits=2))
    ref2 = _reference_forward(x2, y2, beta)
    assert jnp.allclose(loss2, ref2, rtol=1e-5, atol=1e-5), (loss2, ref2)

    # 3) Default fast path: bf16 streaming + auto tile/split planning.
    loss3 = jax.block_until_ready(logreg2_forward(x2, y2, beta))
    assert jnp.allclose(loss3, ref2, rtol=1e-2, atol=1e-2), (loss3, ref2)

    print("KERNEL_OK")
</pallas_src>

<mosaic_0001>
module attributes {stable_mosaic.version = 11 : i64} {
  func.func @_logreg2_bce_kernel(%arg0: i32, %arg1: i32, %arg2: memref<8x32xf32, #tpu.memory_space<vmem>>, %arg3: memref<1xf32, #tpu.memory_space<smem>>, %arg4: memref<128x32xf32, #tpu.memory_space<vmem>>, %arg5: memref<1x128xf32, #tpu.memory_space<vmem>>, %arg6: memref<1x128xf32, #tpu.memory_space<vmem>>, %arg7: memref<8x128xf32, #tpu.memory_space<vmem>>) attributes {dimension_semantics = [#tpu.dimension_semantics<parallel>, #tpu.dimension_semantics<arbitrary>], iteration_bounds = array<i64: 1, 1>, scalar_prefetch = 0 : i64, scratch_operands = 1 : i64, tpu.core_type = #tpu.core_type<tc>, window_params = [{pipeline_mode = #tpu.pipeline_mode<synchronous>, transform_indices = @transform_0, window_bounds = array<i64: 8, 32>}, {transform_indices = @transform_1, window_bounds = array<i64: 1>}, {transform_indices = @transform_2, window_bounds = array<i64: 128, 32>}, {transform_indices = @transform_3, window_bounds = array<i64: 1, 128>}, {transform_indices = @transform_4, window_bounds = array<i64: 1, 128>}]} {
    %c0_i32 = arith.constant 0 : i32
    %0 = arith.cmpi eq, %arg1, %c0_i32 : i32
    %1 = arith.extui %0 : i1 to i32
    %c0_i32_0 = arith.constant 0 : i32
    %2 = arith.cmpi ne, %1, %c0_i32_0 : i32
    scf.if %2 {
      %cst_14 = arith.constant 0.000000e+00 : f32
      %34 = vector.broadcast %cst_14 : f32 to vector<8x128xf32>
      %c0_15 = arith.constant 0 : index
      %c0_16 = arith.constant 0 : index
      %35 = vector.load %arg7[%c0_15, %c0_16] : memref<8x128xf32, #tpu.memory_space<vmem>>, vector<8x128xf32>
      tpu.vector_store %arg7[%c0_15, %c0_16], %34 {strides = array<i32>} : memref<8x128xf32, #tpu.memory_space<vmem>>, vector<8x128xf32>,
    } else {
    }
    %c0 = arith.constant 0 : index
    %c0_1 = arith.constant 0 : index
    %3 = vector.load %arg4[%c0, %c0_1] : memref<128x32xf32, #tpu.memory_space<vmem>>, vector<128x32xf32>
    %c0_2 = arith.constant 0 : index
    %c0_3 = arith.constant 0 : index
    %4 = vector.load %arg5[%c0_2, %c0_3] : memref<1x128xf32, #tpu.memory_space<vmem>>, vector<1x128xf32>
    %c0_4 = arith.constant 0 : index
    %c0_5 = arith.constant 0 : index
    %5 = vector.load %arg2[%c0_4, %c0_5] : memref<8x32xf32, #tpu.memory_space<vmem>>, vector<8x32xf32>
    %c0_6 = arith.constant 0 : index
    %6 = memref.load %arg3[%c0_6] : memref<1xf32, #tpu.memory_space<smem>>
    %cst = arith.constant dense<0.000000e+00> : vector<8x128xf32>
    %7 = tpu.matmul %5, %3, %cst {dimension_numbers = #tpu.dot_dimension_numbers<[1], [1], [0], [0], [0, 0, 1, 0], [], []>} : vector<8x32xf32>, vector<128x32xf32>, vector<8x128xf32> -> vector<8x128xf32>
    %8 = vector.broadcast %6 : f32 to vector<8x128xf32>
    %9 = arith.addf %7, %8 : vector<8x128xf32>
    %cst_7 = arith.constant 0.000000e+00 : f32
    %10 = vector.broadcast %cst_7 : f32 to vector<8x128xf32>
    %11 = arith.maximumf %9, %10 : vector<8x128xf32>
    %12 = vector.broadcast %4 : vector<1x128xf32> to vector<8x128xf32>
    %13 = arith.mulf %9, %12 : vector<8x128xf32>
    %14 = arith.subf %11, %13 : vector<8x128xf32>
    %15 = math.absf %9 : vector<8x128xf32>
    %cst_8 = arith.constant 0.000000e+00 : f32
    %16 = vector.broadcast %cst_8 : f32 to vector<8x128xf32>
    %17 = arith.subf %16, %15 : vector<8x128xf32>
    %18 = math.exp %17 : vector<8x128xf32>
    %19 = math.log1p %18 : vector<8x128xf32>
    %20 = arith.addf %14, %19 : vector<8x128xf32>
    %c1_i32 = arith.constant 1 : i32
    %21 = arith.muli %arg0, %c1_i32 : i32
    %22 = arith.addi %21, %arg1 : i32
    %c128_i32 = arith.constant 128 : i32
    %23 = arith.muli %22, %c128_i32 : i32
    %c128_i32_9 = arith.constant 128 : i32
    %24 = arith.addi %23, %c128_i32_9 : i32
    %c8_i32 = arith.constant 8 : i32
    %25 = arith.cmpi sgt, %24, %c8_i32 : i32
    %true = arith.constant true
    %26 = arith.xori %25, %true : i1
    %27 = arith.extui %26 : i1 to i32
    %c0_i32_10 = arith.constant 0 : i32
    %28 = arith.cmpi ne, %27, %c0_i32_10 : i32
    scf.if %28 {
      %c0_14 = arith.constant 0 : index
      %c0_15 = arith.constant 0 : index
      %34 = vector.load %arg7[%c0_14, %c0_15] : memref<8x128xf32, #tpu.memory_space<vmem>>, vector<8x128xf32>
      %35 = arith.addf %34, %20 : vector<8x128xf32>
      %c0_16 = arith.constant 0 : index
      %c0_17 = arith.constant 0 : index
      %36 = vector.load %arg7[%c0_16, %c0_17] : memref<8x128xf32, #tpu.memory_space<vmem>>, vector<8x128xf32>
      tpu.vector_store %arg7[%c0_16, %c0_17], %35 {strides = array<i32>} : memref<8x128xf32, #tpu.memory_space<vmem>>, vector<8x128xf32>,
    } else {
    }
    %29 = arith.extui %25 : i1 to i32
    %c0_i32_11 = arith.constant 0 : i32
    %30 = arith.cmpi ne, %29, %c0_i32_11 : i32
    scf.if %30 {
      %34 = tpu.iota {dimensions = array<i32: 1>} : vector<8x128xi32>
      %35 = vector.broadcast %23 : i32 to vector<8x128xi32>
      %36 = arith.addi %35, %34 : vector<8x128xi32>
      %c8_i32_14 = arith.constant 8 : i32
      %37 = vector.broadcast %c8_i32_14 : i32 to vector<8x128xi32>
      %38 = arith.cmpi slt, %36, %37 : vector<8x128xi32>
      %cst_15 = arith.constant 0.000000e+00 : f32
      %39 = vector.broadcast %cst_15 : f32 to vector<8x128xf32>
      %40 = arith.select %38, %20, %39 : vector<8x128xi1>, vector<8x128xf32>
      %c0_16 = arith.constant 0 : index
      %c0_17 = arith.constant 0 : index
      %41 = vector.load %arg7[%c0_16, %c0_17] : memref<8x128xf32, #tpu.memory_space<vmem>>, vector<8x128xf32>
      %42 = arith.addf %41, %40 : vector<8x128xf32>
      %c0_18 = arith.constant 0 : index
      %c0_19 = arith.constant 0 : index
      %43 = vector.load %arg7[%c0_18, %c0_19] : memref<8x128xf32, #tpu.memory_space<vmem>>, vector<8x128xf32>
      tpu.vector_store %arg7[%c0_18, %c0_19], %42 {strides = array<i32>} : memref<8x128xf32, #tpu.memory_space<vmem>>, vector<8x128xf32>,
    } else {
    }
    %c0_i32_12 = arith.constant 0 : i32
    %31 = arith.cmpi eq, %arg1, %c0_i32_12 : i32
    %32 = arith.extui %31 : i1 to i32
    %c0_i32_13 = arith.constant 0 : i32
    %33 = arith.cmpi ne, %32, %c0_i32_13 : i32
    scf.if %33 {
      %c0_14 = arith.constant 0 : index
      %c0_15 = arith.constant 0 : index
      %34 = vector.load %arg7[%c0_14, %c0_15] : memref<8x128xf32, #tpu.memory_space<vmem>>, vector<1x128xf32>
      %35 = vector.shape_cast %34 : vector<1x128xf32> to vector<1x1x128xf32>
      %cst_16 = arith.constant dense<0.000000e+00> : vector<1xf32>
      %36 = vector.multi_reduction <add>, %35, %cst_16 [1, 2] : vector<1x1x128xf32> to vector<1xf32>
      %37 = vector.shape_cast %36 : vector<1xf32> to vector<1x1x1xf32>
      %38 = vector.extract %37[0, 0, 0] : f32 from vector<1x1x1xf32>
      %cst_17 = arith.constant 1.250000e-01 : f32
      %39 = arith.mulf %38, %cst_17 : f32
      %cst_18 = arith.constant 0.000000e+00 : f32
      %40 = vector.broadcast %cst_18 : f32 to vector<1x128xf32>
      %41 = vector.broadcast %39 : f32 to vector<1x128xf32>
      %42 = arith.addf %40, %41 : vector<1x128xf32>
      %c0_19 = arith.constant 0 : index
      %c0_20 = arith.constant 0 : index
      %43 = vector.load %arg6[%c0_19, %c0_20] : memref<1x128xf32, #tpu.memory_space<vmem>>, vector<1x128xf32>
      tpu.vector_store %arg6[%c0_19, %c0_20], %42 {strides = array<i32>} : memref<1x128xf32, #tpu.memory_space<vmem>>, vector<1x128xf32>,
    } else {
    }
    return
  }
  func.func @transform_0(%arg0: i32, %arg1: i32) -> (i32, i32) {
    %c0_i32 = arith.constant 0 : i32
    %c0_i32_0 = arith.constant 0 : i32
    %c0_i32_1 = arith.constant 0 : i32
    return %c0_i32, %c0_i32_0 : i32, i32
  }
  func.func @transform_1(%arg0: i32, %arg1: i32) -> i32 {
    %c0_i32 = arith.constant 0 : i32
    %c0_i32_0 = arith.constant 0 : i32
    return %c0_i32 : i32
  }
  func.func @transform_2(%arg0: i32, %arg1: i32) -> (i32, i32) {
    %c1_i32 = arith.constant 1 : i32
    %0 = arith.muli %arg0, %c1_i32 : i32
    %1 = arith.addi %0, %arg1 : i32
    %c0_i32 = arith.constant 0 : i32
    %2 = arith.minsi %1, %c0_i32 : i32
    %c0_i32_0 = arith.constant 0 : i32
    %c0_i32_1 = arith.constant 0 : i32
    return %2, %c0_i32_0 : i32, i32
  }
  func.func @transform_3(%arg0: i32, %arg1: i32) -> (i32, i32) {
    %c1_i32 = arith.constant 1 : i32
    %0 = arith.muli %arg0, %c1_i32 : i32
    %1 = arith.addi %0, %arg1 : i32
    %c0_i32 = arith.constant 0 : i32
    %2 = arith.minsi %1, %c0_i32 : i32
    %c0_i32_0 = arith.constant 0 : i32
    %c0_i32_1 = arith.constant 0 : i32
    return %c0_i32_0, %2 : i32, i32
  }
  func.func @transform_4(%arg0: i32, %arg1: i32) -> (i32, i32) {
    %c0_i32 = arith.constant 0 : i32
    %c0_i32_0 = arith.constant 0 : i32
    return %c0_i32, %arg0 : i32, i32
  }
}

</mosaic_0001>

<bundles_post_ra>
// kernel: tpu_custom_call.1
= control target key start
LH: loop header
LB: loop body
LE: loop exit
PB: predicated region body
PF: predicated region fallthrough
CT: control target
= control target key end

     0   :  { %10 = vsyncpa [#allocation5], 0  ;;  %s531_s0 = inlined_call_operand.hbm [shape: f32[8,32], index: 0, kind: input, shape index: {}]   ;;  %s532_s1 = inlined_call_operand.<no memory space> [shape: f32[1], index: 1, kind: input, shape index: {}]   ;;  %s533_s2 = inlined_call_operand.hbm [shape: f32[8,32], index: 2, kind: input, shape index: {}]   ;;  %s534_s3 = inlined_call_operand.vmem [shape: f32[1,8], index: 3, kind: input, shape index: {}]   ;;  %s535_s4 = inlined_call_operand.hbm [shape: f32[1,128], index: 4, kind: output, shape index: {}]  }
   0x1   :  { %11 = vsyncpa [#allocation8], 0 }
   0x2   :  { %12 = vsyncpa [#allocation6], 0  ;;  %s467_s15 = smov [#allocation4]  }
   0x3   :  { %s19_s16 = sshll.u32 %s467_s15, 4  ;;  %s20_s16 = int_to_ptr.vmem [resolvable:$true] %s19_s16 }
   0x4   :  { %s409_s17 = scalar_lea.vmem %s20_s16, 128  ;;  %p414_p1 = scmp.lt.s32.totalorder %s20_s16, %s20_s16 }
   0x5   :  { %p410_p0 = scmp.ne.s32.totalorder %s20_s16, %s409_s17  ;;  %p415_p2 = scmp.lt.s32.totalorder %s409_s17, %s409_s17 }
   0x7   :  { %p416_p3 = por %p415_p2, %p414_p1 }
   0x9   :  { %p417_p4 = pnand %p416_p3, %p410_p0 }
   0xb   :  { %420 = shalt.err (!%p417_p4)
}
   0xc   :  { %22 = dma.hbm_to_vmem [thread:$0]  %s531_s0, 128, %s20_s16, [#allocation5]  }
   0xd   :  { %35 = vsyncadd [#allocation8], 1920  ;;  %s468_s20 = smov [#allocation7]  }
   0xe   :  { %s40_s21 = sshll.u32 %s468_s20, 4  ;;  %s41_s21 = int_to_ptr.vmem [resolvable:$true] %s40_s21 }
   0xf   :  { %s429_s22 = scalar_lea.vmem %s41_s21, 128  ;;  %s433_s23 = scalar_lea.vmem %s41_s21, 2048 }
  0x10   :  { %p430_p5 = scmp.ne.s32.totalorder %s41_s21, %s429_s22  ;;  %p434_p6 = scmp.lt.s32.totalorder %s41_s21, %s41_s21 }
  0x11   :  { %p435_p7 = scmp.lt.s32.totalorder %s433_s23, %s429_s22 }
  0x13   :  { %p436_p8 = por %p435_p7, %p434_p6 }
  0x15   :  { %p437_p9 = pnand %p436_p8, %p430_p5 }
  0x17   :  { %440 = shalt.err (!%p437_p9)
}
  0x18   :  { %s469_s24 = smov 128   ;;  %s470_s25 = smov 8  }
  0x19   :  { %46 = dma.hbm_to_vmem [thread:$0]  %s533_s2, 128, %s41_s21, [#allocation8], %s469_s24, %s469_s24, %s470_s25  }
  0x1a   :  { %461 = dma.done.wait [#allocation5], 128  }
  0x1b   :  { %462 = vsyncadd [#allocation5], 4294967168 }
  0x1c   :  { %463 = dma.done.wait [#allocation8], 2048  }
  0x1d   :  { %464 = vsyncadd [#allocation8], 4294965248  ;;  %v471_v0 = vmov 0.0   ;;  %vm472_vm0 = vmmov 0   ;;  %vm110_vm1 = vcmask 261120   ;;  %v105_v1 = vld [vmem:[#allocation7 + $0x78] sm:$0xff]  ;;  %v109_v18 = vstv %s532_s1 }
  0x1e   :  { %353 = vmatprep.subr.mxu0 %v471_v0  ;;  %385 = vmatprep.mubr.msk.f32.mxu0 %vm472_vm0, %v471_v0  ;;  %v104_v2 = vld [vmem:[#allocation7 + $0x70] sm:$0xff]  ;;  %v103_v3 = vld [vmem:[#allocation7 + $0x68] sm:$0xff]  ;;  %v102_v4 = vld [vmem:[#allocation7 + $0x60] sm:$0xff]  ;;  %v269_v29 = vlaneseq  ;;  %vm282_vm4 = vcmask 1040384   ;;  %s473_s1 = smov [#allocation9]  }
  0x1f   :  { %354 = vmatpush3.xpose.msk.msra.mxu0 %vm110_vm1, %v105_v1  ;;  %v101_v5 = vld [vmem:[#allocation7 + $0x58] sm:$0xff]  ;;  %v100_v6 = vld [vmem:[#allocation7 + $0x50] sm:$0xff]  ;;  %v99_v7 = vld [vmem:[#allocation7 + $0x48] sm:$0xff] }
  0x20   :  { %355 = vmatprep.subr.mxu0 %v471_v0  ;;  %v98_v8 = vld [vmem:[#allocation7 + $0x40] sm:$0xff]  ;;  %v97_v9 = vld [vmem:[#allocation7 + $0x38] sm:$0xff]  ;;  %v96_v10 = vld [vmem:[#allocation7 + $0x30] sm:$0xff]  ;;  %v270_v34 = vand.u32 127, %v269_v29 }
  0x21   :  { %v95_v11 = vld [vmem:[#allocation7 + $0x28] sm:$0xff]  ;;  %v94_v12 = vld [vmem:[#allocation7 + $0x20] sm:$0xff]  ;;  %v93_v13 = vld [vmem:[#allocation7 + $0x18] sm:$0xff] }
  0x22   :  { %v92_v14 = vld [vmem:[#allocation7 + $0x10] sm:$0xff]  ;;  %v91_v15 = vld [vmem:[#allocation7 + $0x8] sm:$0xff]  ;;  %v90_v16 = vld [vmem:[#allocation7] sm:$0xff]  ;;  %vm273_vm3 = vcmp.lt.s32.totalorder %v270_v34, 8 }
  0x23   :  { %356 = vmatpush3.xpose.msk.msra.mxu0 %vm110_vm1, %v104_v2  ;;  %v107_v17 = vld [vmem:[#allocation4] sm:$0xff]  ;;  %v335_v28 = vld [vmem:[%s534_s3] ss:$0 sm:$0xff]  ;;  %s303_s3 = sshll.u32 %s473_s1, 4  ;;  %s304_s3 = int_to_ptr.vmem [resolvable:$true] %s303_s3 }
  0x24   :  { %357 = vmatprep.subr.mxu0 %v471_v0  ;;  %s441_s6 = scalar_lea.vmem %s304_s3, 16  ;;  %s445_s7 = scalar_lea.vmem %s304_s3, 32 }
  0x25   :  { %p442_p10 = scmp.ne.s32.totalorder %s304_s3, %s441_s6  ;;  %p446_p11 = scmp.lt.s32.totalorder %s304_s3, %s304_s3 }
  0x26   :  { %p447_p12 = scmp.lt.s32.totalorder %s445_s7, %s441_s6 }
  0x27   :  { %358 = vmatpush3.xpose.msk.msra.mxu0 %vm110_vm1, %v103_v3 }
  0x28   :  { %359 = vmatprep.subr.mxu0 %v471_v0  ;;  %p448_p13 = por %p447_p12, %p446_p11 }
  0x2a   :  { %p449_p0 = pnand %p448_p13, %p442_p10 }
  0x2b   :  { %360 = vmatpush3.xpose.msk.msra.mxu0 %vm110_vm1, %v102_v4 }
  0x2c   :  { %361 = vmatprep.subr.mxu0 %v471_v0 }
  0x2f   :  { %362 = vmatpush3.xpose.msk.msra.mxu0 %vm110_vm1, %v101_v5 }
  0x30   :  { %363 = vmatprep.subr.mxu0 %v471_v0 }
  0x33   :  { %364 = vmatpush3.xpose.msk.msra.mxu0 %vm110_vm1, %v100_v6 }
  0x34   :  { %365 = vmatprep.subr.mxu0 %v471_v0 }
  0x37   :  { %366 = vmatpush3.xpose.msk.msra.mxu0 %vm110_vm1, %v99_v7 }
  0x38   :  { %367 = vmatprep.subr.mxu0 %v471_v0 }
  0x3b   :  { %368 = vmatpush3.xpose.msk.msra.mxu0 %vm110_vm1, %v98_v8 }
  0x3c   :  { %369 = vmatprep.subr.mxu0 %v471_v0 }
  0x3f   :  { %370 = vmatpush3.xpose.msk.msra.mxu0 %vm110_vm1, %v97_v9 }
  0x40   :  { %371 = vmatprep.subr.mxu0 %v471_v0 }
  0x43   :  { %372 = vmatpush3.xpose.msk.msra.mxu0 %vm110_vm1, %v96_v10 }
  0x44   :  { %373 = vmatprep.subr.mxu0 %v471_v0 }
  0x47   :  { %374 = vmatpush3.xpose.msk.msra.mxu0 %vm110_vm1, %v95_v11 }
  0x48   :  { %375 = vmatprep.subr.mxu0 %v471_v0 }
  0x4b   :  { %376 = vmatpush3.xpose.msk.msra.mxu0 %vm110_vm1, %v94_v12 }
  0x4c   :  { %377 = vmatprep.subr.mxu0 %v471_v0 }
  0x4f   :  { %378 = vmatpush3.xpose.msk.msra.mxu0 %vm110_vm1, %v93_v13 }
  0x50   :  { %379 = vmatprep.subr.mxu0 %v471_v0 }
  0x53   :  { %380 = vmatpush3.xpose.msk.msra.mxu0 %vm110_vm1, %v92_v14 }
  0x54   :  { %381 = vmatprep.subr.mxu0 %v471_v0 }
  0x57   :  { %382 = vmatpush3.xpose.msk.msra.mxu0 %vm110_vm1, %v91_v15 }
  0x58   :  { %383 = vmatprep.subr.mxu0 %v471_v0 }
  0x5b   :  { %384 = vmatpush3.xpose.msk.msra.mxu0 %vm110_vm1, %v90_v16 }
  0x5e   :  { %386 = vmatmul.mubr.msk.f32.vlgmr.msra.gmra.mxu0 %vm110_vm1, %v107_v17 }
 0x11e   :  { %v228_v19 = vpop.f32.mrf.mxu0 }
 0x11f   :  { %v229_v20 = vadd.f32 %v228_v19, %v109_v18 }
 0x120   :  { %v387_v21 = vpop.f32.mrf.mxu0 }
 0x121   :  { %v241_v22 = vand.u32 2147483647, %v229_v20  ;;  %v232_v31 = vmax.f32 %v229_v20, 0.0  ;;  %v239_v32 = vmul.f32 %v335_v28, %v229_v20 }
 0x123   :  { %v242_v23 = vsub.f32 0.0, %v241_v22  ;;  %v240_v38 = vsub.f32 %v232_v31, %v239_v32 }
 0x125   :  { %v243_v24 = vmul.f32 1.442695, %v242_v23 }
 0x127   :  { %397 = vpow2.f32 %v243_v24 }
 0x134   :  { %v398_v25 = vpop.eup %397 }
 0x135   :  { %v245_v26 = vadd.f32 1.0, %v398_v25  ;;  %v248_v27 = vmul.f32 -0.5, %v398_v25  ;;  %v251_v33 = vand.u32 2147483647, %v398_v25 }
 0x137   :  { %399 = vlog2.f32 %v245_v26  ;;  %v249_v30 = vadd.f32 1.0, %v248_v27  ;;  %vm252_vm2 = vcmp.lt.f32.partialorder %v251_v33, 0.0004427343 }
 0x139   :  { %v250_v37 = vmul.f32 %v398_v25, %v249_v30 }
 0x144   :  { %v400_v35 = vpop.eup %399 }
 0x145   :  { %v247_v36 = vmul.f32 0.6931472, %v400_v35 }
 0x147   :  { %v253_v39 = vsel %vm252_vm2, %v250_v37, %v247_v36 }
 0x148   :  { %v254_v40 = vadd.f32 %v253_v39, %v240_v38 }
 0x14a   :  { %v274_v41 = vsel %vm273_vm3, %v254_v40, 0.0 }
 0x14b   :  { %277 = vst [vmem:[#allocation2] sm:$0xff] %v274_v41 }
 0x152   :  { %v281_v42 = vld [vmem:[#allocation2] sm:$0x1] }
 0x153   :  { %v283_v43 = vsel %vm282_vm4, %v281_v42, 0.0 }
 0x154   :  { %284 = vadd.xlane.f32.xlu0 %v283_v43 }
 0x1dd   :  { %v285_v44 = vpop.xlane.xlu0 %284 }
 0x1de   :  { %v286_v45 = vrot.slane %v285_v44, 4 }
 0x1e0   :  { %v287_v46 = vadd.f32 %v286_v45, %v285_v44 }
 0x1e2   :  { %v288_v47 = vrot.slane %v287_v46, 2 }
 0x1e4   :  { %v289_v48 = vadd.f32 %v288_v47, %v287_v46 }
 0x1e6   :  { %v290_v49 = vrot.slane %v289_v48, 1 }
 0x1e8   :  { %v291_v50 = vadd.f32 %v290_v49, %v289_v48 }
 0x1ea   :  { %388 = vpush %v291_v50 }
 0x21b   :  { %s389_s30 = spop %388 }
 0x21c   :  { %s293_s5 = smul.f32 0.125, %s389_s30 }
 0x21e   :  { %v294_v51 = vstv %s293_s5 }
 0x21f   :  { %296 = vst [vmem:[#allocation9] sm:$0x1] %v294_v51 }
 0x220   :  { %452 = shalt.err (!%p449_p0)
}
 0x221   :  { %306 = dma.vmem_to_hbm [thread:$0]  %s304_s3, 16, %s535_s4, [#allocation6]  }
 0x222   :  { %465 = dma.done.wait [#allocation6], 16  }
 0x223   :  { %466 = vsyncadd [#allocation6], 4294967280 }
 0x224   :  { %310 = vsyncpa [#allocation5], 1 }
 0x225   :  { %311 = vsyncpa [#allocation8], 1 }
 0x226   :  { %312 = vsyncpa [#allocation6], 1 }

</bundles_post_ra>
